<compile_context>
chip_gen: v7x
topology: tpu7x:2x2x1
jax: 0.10.0
libtpu: 0.0.40
codegen_flags: <defaults>
</compile_context>

<pallas_src>
import numpy as np
import jax
import jax.numpy as jnp
from jax.experimental import pallas as pl
from jax.experimental.pallas import tpu as pltpu


# --------------------------------------------------------------------------
# Deterministic parameter setup (numpy re-implementation of KernelGAN's
# create_penalty_mask / create_gaussian — host-side constant glue).
# --------------------------------------------------------------------------
def create_gaussian(size, sigma1):
    zs = np.arange(-size // 2 + 1, size // 2 + 1, dtype=np.float64)
    func1 = np.exp(-zs ** 2 / (2.0 * sigma1 ** 2)) / np.sqrt(2.0 * np.pi * sigma1 ** 2)
    return np.outer(func1, func1)


def create_penalty_mask(k_size, penalty_scale):
    center_size = k_size // 2 + k_size % 2
    mask = create_gaussian(size=k_size, sigma1=k_size)
    mask = 1.0 - mask / np.max(mask)
    margin = (k_size - center_size) // 2 - 1
    if margin > 0:  # guard: for tiny k_size the slice would otherwise misbehave
        mask[margin:-margin, margin:-margin] = 0.0
    return (penalty_scale * mask).astype(np.float32)


# --------------------------------------------------------------------------
# Pallas kernel: elementwise multiply (VPU) + abs (VPU) + full reduce (XLU).
# m_ref already carries penalty_scale * mask / n_elems, so sum(|k * m|) IS the
# L1 mean — no epilogue divide.
# --------------------------------------------------------------------------
def _boundaries_loss_kernel(k_ref, m_ref, o_ref):
    o_ref[0, 0] = jnp.sum(jnp.abs(k_ref[...] * m_ref[...]))


# --------------------------------------------------------------------------
# Factory: builds the device-resident pre-scaled mask once and returns a
# jitted loss(kernel) closure.  One pallas_call, one full-array block.
# --------------------------------------------------------------------------
def make_boundaries_loss(k_size, penalty_scale=30):
    n_elems = k_size * k_size

    # Pre-fold the 1/n_elems of the L1 mean into the (positive) mask.
    mask_np = create_penalty_mask(k_size, penalty_scale) / np.float32(n_elems)
    mask_dev = jnp.asarray(mask_np)  # device-resident constant, built once

    cost = pl.CostEstimate(
        flops=3 * n_elems,                    # mul + abs + add per element
        transcendentals=0,
        bytes_accessed=2 * n_elems * 4 + 4,
    )

    call = pl.pallas_call(
        _boundaries_loss_kernel,
        out_shape=jax.ShapeDtypeStruct((1, 1), jnp.float32),
        in_specs=[
            pl.BlockSpec((k_size, k_size), lambda: (0, 0)),   # full-array block -> VMEM
            pl.BlockSpec((k_size, k_size), lambda: (0, 0)),
        ],
        out_specs=pl.BlockSpec((1, 1), lambda: (0, 0), memory_space=pltpu.SMEM),
        cost_estimate=cost,
    )

    @jax.jit
    def loss_fn(kernel):
        # Trace-time dtype check: no runtime cast when the kernel is already f32.
        k = kernel if kernel.dtype == jnp.float32 else kernel.astype(jnp.float32)
        return call(k, mask_dev)[0, 0]

    return loss_fn


if __name__ == "__main__":
    K_SIZE = 16  # blur-kernel side length, consistent with the module

    loss_fn = make_boundaries_loss(K_SIZE, 30)

    key = jax.random.PRNGKey(0)
    kernel = jax.random.normal(key, (K_SIZE, K_SIZE), dtype=jnp.float32)

    loss = loss_fn(kernel)
    loss = jax.block_until_ready(loss)

    # Pure-JAX reference of the forward semantics (unscaled mask + L1 mean).
    mask_ref = jnp.asarray(create_penalty_mask(K_SIZE, 30))
    ref = jnp.mean(jnp.abs(kernel * mask_ref))
    assert np.allclose(np.asarray(loss), np.asarray(ref), rtol=1e-5, atol=1e-6), (
        float(loss), float(ref))

    print("KERNEL_OK")
</pallas_src>

<mosaic_0001>
module attributes {stable_mosaic.version = 11 : i64} {
  func.func @_boundaries_loss_kernel(%arg0: memref<16x16xf32, #tpu.memory_space<vmem>>, %arg1: memref<16x16xf32, #tpu.memory_space<vmem>>, %arg2: memref<1x1xf32, #tpu.memory_space<smem>>) attributes {dimension_semantics = [], scalar_prefetch = 0 : i64, scratch_operands = 0 : i64, tpu.core_type = #tpu.core_type<tc>} {
    %c0 = arith.constant 0 : index
    %c0_0 = arith.constant 0 : index
    %0 = vector.load %arg0[%c0, %c0_0] : memref<16x16xf32, #tpu.memory_space<vmem>>, vector<16x16xf32>
    %c0_1 = arith.constant 0 : index
    %c0_2 = arith.constant 0 : index
    %1 = vector.load %arg1[%c0_1, %c0_2] : memref<16x16xf32, #tpu.memory_space<vmem>>, vector<16x16xf32>
    %2 = arith.mulf %0, %1 : vector<16x16xf32>
    %3 = math.absf %2 : vector<16x16xf32>
    %4 = vector.shape_cast %3 : vector<16x16xf32> to vector<1x16x16xf32>
    %cst = arith.constant dense<0.000000e+00> : vector<1xf32>
    %5 = vector.multi_reduction <add>, %4, %cst [1, 2] : vector<1x16x16xf32> to vector<1xf32>
    %6 = vector.shape_cast %5 : vector<1xf32> to vector<1x1x1xf32>
    %7 = vector.extract %6[0, 0, 0] : f32 from vector<1x1x1xf32>
    %c0_3 = arith.constant 0 : index
    %c0_4 = arith.constant 0 : index
    %8 = memref.load %arg2[%c0_3, %c0_4] : memref<1x1xf32, #tpu.memory_space<smem>>
    memref.store %7, %arg2[%c0_3, %c0_4] : memref<1x1xf32, #tpu.memory_space<smem>>
    return
  }
}

</mosaic_0001>

<bundles_post_ra>
// kernel: loss_fn.1
= control target key start
LH: loop header
LB: loop body
LE: loop exit
PB: predicated region body
PF: predicated region fallthrough
CT: control target
= control target key end

     0   :  { %7 = vsyncpa [#allocation3], 0  ;;  %s201_s0 = inlined_call_operand.hbm [shape: f32[16,16], index: 0, kind: input, shape index: {}]   ;;  %s202_s1 = inlined_call_operand.hbm [shape: f32[16,16], index: 1, kind: input, shape index: {}]   ;;  %s203_s2 = inlined_call_operand.hbm [shape: f32[1,1], index: 2, kind: output, shape index: {}]  }
   0x1   :  { %8 = vsyncpa [#allocation6], 0 }
   0x2   :  { %9 = vsyncpa [#allocation4], 0  ;;  %s145_s9 = smov [#allocation2]   ;;  %s85_s13 = scalar_lea.hbm %s201_s0, 256 }
   0x3   :  { %s15_s10 = sshll.u32 %s145_s9, 4  ;;  %p86_p0 = scmp.ne.s32.totalorder %s201_s0, %s85_s13  ;;  %s16_s10 = int_to_ptr.vmem [resolvable:$true] %s15_s10 }
   0x4   :  { %p89_p1 = scmp.lt.u32.totalorder %s85_s13, %s201_s0 }
   0x6   :  { %p91_p2 = pnand %p89_p1, %p86_p0 }
   0x8   :  { %94 = shalt.err (!%p91_p2)
}
   0x9   :  { %s95_s18 = scalar_lea.vmem %s16_s10, 256  ;;  %p100_p4 = scmp.lt.s32.totalorder %s16_s10, %s16_s10 }
   0xa   :  { %p96_p3 = scmp.ne.s32.totalorder %s16_s10, %s95_s18  ;;  %p101_p5 = scmp.lt.s32.totalorder %s95_s18, %s95_s18 }
   0xc   :  { %p102_p6 = por %p101_p5, %p100_p4 }
   0xe   :  { %p103_p7 = pnand %p102_p6, %p96_p3 }
  0x10   :  { %106 = shalt.err (!%p103_p7)
}
  0x11   :  { %s146_s19 = smov 128   ;;  %s147_s20 = smov 8  }
  0x12   :  { %21 = dma.hbm_to_vmem [thread:$0]  %s201_s0, 256, %s16_s10, [#allocation3], %s146_s19, %s146_s19, %s147_s20  }
  0x13   :  { %s148_s23 = smov [#allocation5]   ;;  %s107_s27 = scalar_lea.hbm %s202_s1, 256 }
  0x14   :  { %s27_s24 = sshll.u32 %s148_s23, 4  ;;  %p108_p8 = scmp.ne.s32.totalorder %s202_s1, %s107_s27  ;;  %s28_s24 = int_to_ptr.vmem [resolvable:$true] %s27_s24 }
  0x15   :  { %p111_p9 = scmp.lt.u32.totalorder %s107_s27, %s202_s1 }
  0x17   :  { %p113_p10 = pnand %p111_p9, %p108_p8 }
  0x19   :  { %116 = shalt.err (!%p113_p10)
}
  0x1a   :  { %s117_s4 = scalar_lea.vmem %s28_s24, 256  ;;  %p122_p12 = scmp.lt.s32.totalorder %s28_s24, %s28_s24 }
  0x1b   :  { %p118_p11 = scmp.ne.s32.totalorder %s28_s24, %s117_s4  ;;  %p123_p13 = scmp.lt.s32.totalorder %s117_s4, %s117_s4 }
  0x1d   :  { %p124_p0 = por %p123_p13, %p122_p12 }
  0x1f   :  { %p125_p1 = pnand %p124_p0, %p118_p11 }
  0x21   :  { %128 = shalt.err (!%p125_p1)
}
  0x22   :  { %33 = dma.hbm_to_vmem [thread:$0]  %s202_s1, 256, %s28_s24, [#allocation6], %s146_s19, %s146_s19, %s147_s20  }
  0x23   :  { %139 = dma.done.wait [#allocation3], 256  }
  0x24   :  { %140 = vsyncadd [#allocation3], 4294967040 }
  0x25   :  { %141 = dma.done.wait [#allocation6], 256  }
  0x26   :  { %142 = vsyncadd [#allocation6], 4294967040  ;;  %v40_v0 = vld [vmem:[#allocation2] sm:$0xff]  ;;  %v41_v1 = vld [vmem:[#allocation2 + $0x8] sm:$0xff]  ;;  %vm48_vm0 = vcmask 130048   ;;  %s129_s8 = scalar_lea.hbm %s203_s2, 16 }
  0x27   :  { %v42_v2 = vld [vmem:[#allocation5] sm:$0xff]  ;;  %v43_v3 = vld [vmem:[#allocation5 + $0x8] sm:$0xff]  ;;  %p130_p2 = scmp.ne.s32.totalorder %s203_s2, %s129_s8  ;;  %p133_p3 = scmp.lt.u32.totalorder %s129_s8, %s203_s2 }
  0x28   :  { %v44_v4 = vmul.f32 %v42_v2, %v40_v0  ;;  %v45_v5 = vmul.f32 %v43_v3, %v41_v1 }
  0x29   :  { %p135_p4 = pnand %p133_p3, %p130_p2 }
  0x2a   :  { %v46_v6 = vand.u32 2147483647, %v44_v4  ;;  %v47_v7 = vand.u32 2147483647, %v45_v5 }
  0x2c   :  { %v49_v8 = vsel %vm48_vm0, %v46_v6, 0.0  ;;  %v50_v9 = vsel %vm48_vm0, %v47_v7, 0.0 }
  0x2d   :  { %v51_v10 = vadd.f32 %v50_v9, %v49_v8 }
  0x2f   :  { %52 = vadd.xlane.f32.xlu0 %v51_v10 }
  0xbc   :  { %v53_v11 = vpop.xlane.xlu0 %52 }
  0xbd   :  { %v54_v12 = vrot.slane %v53_v11, 4 }
  0xbf   :  { %v55_v13 = vadd.f32 %v54_v12, %v53_v11 }
  0xc1   :  { %v56_v14 = vrot.slane %v55_v13, 2 }
  0xc3   :  { %v57_v15 = vadd.f32 %v56_v14, %v55_v13 }
  0xc5   :  { %v58_v16 = vrot.slane %v57_v15, 1 }
  0xc7   :  { %v59_v17 = vadd.f32 %v58_v16, %v57_v15 }
  0xc9   :  { %78 = vpush %v59_v17 }
  0xfa   :  { %s79_s1 = spop %78 }
  0xfb   :  { %62 = sst [smem:[#allocation7]] %s79_s1 }
  0xfc   :  { %138 = shalt.err (!%p135_p4)
}
  0xfd   :  { %s149_s13 = smov [#allocation7]  }
  0xfe   :  { %70 = dma.smem_to_hbm %s149_s13, 16, %s203_s2, [#allocation4]  }
  0xff   :  { %143 = dma.done.wait [#allocation4], 16  }
 0x100   :  { %144 = vsyncadd [#allocation4], 4294967280 }
 0x101   :  { %74 = sfence }
 0x102   :  { %75 = vsyncpa [#allocation3], 1 }
 0x103   :  { %76 = vsyncpa [#allocation6], 1 }
 0x104   :  { %77 = vsyncpa [#allocation4], 1 }

</bundles_post_ra>
